<compile_context>
chip_gen: v7x
topology: tpu7x:2x2x1
jax: 0.10.0
libtpu: 0.0.40
codegen_flags: <defaults>
</compile_context>

<pallas_src>
import math

import jax
import jax.numpy as jnp
from jax.experimental import pallas as pl
from jax.experimental.pallas import tpu as pltpu

# ---------------- problem sizes (small, consistent with the module) ----------------
B = 2            # batch
S = 8            # sequence length
D = 32           # d_model
H = 4            # n_heads
HD = D // H      # head_dim = 8
F = 64           # d_ff
DP = 128         # padded lane width
BS = B * S       # folded batch*seq rows = 16
EPS = 1e-5
NEG_INF = -1000000000.0   # matches masked_fill value in the PyTorch code


def decoder_layer_kernel(
    x_ref,      # (BS, DP)   activations, lanes >= D are zero
    mask_ref,   # (BS, BS)   additive mask (0 or NEG_INF), block-diag causal
    wqkv_ref,   # (DP, DP)   [scale*Wq.T | Wk.T | Wv.T] zero-padded
    wo_ref,     # (D, DP)    Wo.T zero-padded on lanes
    w1_ref,     # (DP, DP)   W1.T zero-padded
    b1_ref,     # (1, DP)
    w2_ref,     # (DP, DP)   W2.T zero-padded
    b2_ref,     # (1, DP)
    g1_ref,     # (1, DP)    layernorm1 gamma (zero-padded)
    be1_ref,    # (1, DP)    layernorm1 beta
    g2_ref,     # (1, DP)    layernorm2 gamma
    be2_ref,    # (1, DP)    layernorm2 beta
    out_ref,    # (BS, DP)
):
    x = x_ref[...]               # [BS, DP], pad lanes are zero
    add_mask = mask_ref[...]     # [BS, BS]

    # ---------------- fused QKV projection: one lane-dense MXU matmul ----------------
    # Attention scale is already folded into the Wq columns of wqkv.
    qkv = jnp.dot(x, wqkv_ref[...], preferred_element_type=jnp.float32)   # [BS, DP]

    dims = (((1,), (1,)), ((), ()))   # contract last dims -> q @ k.T (no materialized transpose)

    # TODO(synk): attention / residual dropout layers are identity here (eval mode).
    heads = []
    for h in range(H):                               # static unrolled loop, H is small
        q_h = qkv[:, h * HD:(h + 1) * HD]            # static lane slices of resident value
        k_h = qkv[:, D + h * HD:D + (h + 1) * HD]
        v_h = qkv[:, 2 * D + h * HD:2 * D + (h + 1) * HD]

        s = jax.lax.dot_general(q_h, k_h, dims, preferred_element_type=jnp.float32)  # [BS, BS]
        s = s + add_mask

        # numerically-stable softmax over keys (EUP approx reciprocal for the denominator)
        s = s - jnp.max(s, axis=-1, keepdims=True)
        p = jnp.exp(s)
        p = p * pl.reciprocal(jnp.sum(p, axis=-1, keepdims=True), approx=True)

        heads.append(jnp.dot(p, v_h, preferred_element_type=jnp.float32))  # [BS, HD]

    # heads laid out contiguously along lanes -> single output projection matmul
    y = jnp.concatenate(heads, axis=-1)                                     # [BS, D]
    attn_out = jnp.dot(y, wo_ref[...], preferred_element_type=jnp.float32)  # [BS, DP], pads zero

    # lane-validity mask for LayerNorm over the padded width (hoisted, reused by both LNs)
    lane = jax.lax.broadcasted_iota(jnp.int32, (BS, DP), 1)
    valid = lane < D
    inv_d = 1.0 / D

    def layer_norm(hv, g, b):
        mu = jnp.sum(hv, axis=-1, keepdims=True) * inv_d          # pad lanes are zero
        c = jnp.where(valid, hv - mu, 0.0)
        var = jnp.sum(c * c, axis=-1, keepdims=True) * inv_d
        return c * jax.lax.rsqrt(var + EPS) * g + b               # gamma/beta padded with zeros

    # ---------------- residual + layernorm 1 ----------------
    h1 = layer_norm(x + attn_out, g1_ref[...], be1_ref[...])      # [BS, DP], pads zero

    # ---------------- feed-forward network (lane-dense padded matmuls) ----------------
    f = jnp.dot(h1, w1_ref[...], preferred_element_type=jnp.float32) + b1_ref[...]
    f = jnp.maximum(f, 0.0)
    f = jnp.dot(f, w2_ref[...], preferred_element_type=jnp.float32) + b2_ref[...]

    # ---------------- residual + layernorm 2 ----------------
    out = layer_norm(h1 + f, g2_ref[...], be2_ref[...])
    out_ref[...] = out.astype(out_ref.dtype)


def _full(shape):
    return pl.BlockSpec(shape, lambda i: tuple(0 for _ in shape))


def generative_decoder_layer(tgt, tgt_mask_attn, params):
    """tgt: [B, S, D] f32; tgt_mask_attn: [S, S] bool (True = prevent attending)."""
    (Wq, Wk, Wv, Wo, W1, b1, W2, b2, g1, be1, g2, be2) = params

    # ---- weight prep (all last dims zero-padded to 128; numerically exact) ----
    scale = 1.0 / math.sqrt(HD)
    wqkv = jnp.concatenate([Wq.T * scale, Wk.T, Wv.T], axis=1)     # [D, 3D], scale folded into Wq
    wqkv = jnp.pad(wqkv, ((0, DP - D), (0, DP - 3 * D)))           # [128, 128]
    wo_t = jnp.pad(Wo.T, ((0, 0), (0, DP - D)))                    # [32, 128]
    w1_t = jnp.pad(W1.T, ((0, DP - D), (0, DP - F)))               # [128, 128]
    w2_t = jnp.pad(W2.T, ((0, DP - F), (0, DP - D)))               # [128, 128]

    def pad_vec(v):
        v = v.reshape(1, -1)
        return jnp.pad(v, ((0, 0), (0, DP - v.shape[1])))

    b1p, b2p = pad_vec(b1), pad_vec(b2)
    g1p, be1p = pad_vec(g1), pad_vec(be1)
    g2p, be2p = pad_vec(g2), pad_vec(be2)

    # ---- fold batch into sublanes, zero-pad lanes to 128 ----
    x = jnp.pad(tgt.reshape(BS, D), ((0, 0), (0, DP - D)))         # [16, 128]

    # ---- additive mask: causal mask per batch block + block-diagonal batch separation ----
    idx = jnp.arange(BS)
    same_batch = (idx[:, None] // S) == (idx[None, :] // S)
    prevented = jnp.tile(tgt_mask_attn, (B, B)) | (~same_batch)
    add_mask = jnp.where(prevented, NEG_INF, 0.0).astype(jnp.float32)   # [16, 16]

    out = pl.pallas_call(
        decoder_layer_kernel,
        out_shape=jax.ShapeDtypeStruct((BS, DP), jnp.float32),
        grid=(1,),                      # single step: whole layer fits in VMEM; no per-step overhead
        in_specs=[
            _full((BS, DP)),            # x
            _full((BS, BS)),            # additive mask
            _full((DP, DP)),            # wqkv
            _full((D, DP)),             # wo
            _full((DP, DP)),            # w1
            _full((1, DP)),             # b1
            _full((DP, DP)),            # w2
            _full((1, DP)),             # b2
            _full((1, DP)),             # gamma1
            _full((1, DP)),             # beta1
            _full((1, DP)),             # gamma2
            _full((1, DP)),             # beta2
        ],
        out_specs=_full((BS, DP)),
        compiler_params=pltpu.CompilerParams(dimension_semantics=("arbitrary",)),
    )(x, add_mask, wqkv, wo_t, w1_t, b1p, w2_t, b2p, g1p, be1p, g2p, be2p)

    # wrapper-side layout plumbing: drop lane padding, restore [B, S, D]
    return out[:, :D].reshape(B, S, D)


# ---------------- pure-JAX reference (mirrors the PyTorch forward) ----------------
def reference(tgt, attn_mask, params):
    (Wq, Wk, Wv, Wo, W1, b1, W2, b2, g1, be1, g2, be2) = params
    q = (tgt @ Wq.T).reshape(B, S, H, HD)
    k = (tgt @ Wk.T).reshape(B, S, H, HD)
    v = (tgt @ Wv.T).reshape(B, S, H, HD)
    attn = jnp.einsum('bshd,bthd->bhst', q, k) / math.sqrt(HD)
    attn = jnp.where(attn_mask[None, None, :, :], NEG_INF, attn)
    attn = jax.nn.softmax(attn, axis=-1)
    y = jnp.einsum('bhst,bthd->bshd', attn, v).reshape(B, S, D)
    y = y @ Wo.T

    def ln(x, g, b):
        mu = jnp.mean(x, axis=-1, keepdims=True)
        var = jnp.mean((x - mu) ** 2, axis=-1, keepdims=True)
        return (x - mu) / jnp.sqrt(var + EPS) * g + b

    x1 = ln(tgt + y, g1, be1)
    f = jnp.maximum(x1 @ W1.T + b1, 0.0) @ W2.T + b2
    return ln(x1 + f, g2, be2)


if __name__ == "__main__":
    key = jax.random.PRNGKey(0)
    keys = jax.random.split(key, 16)

    tgt = jax.random.normal(keys[0], (B, S, D), dtype=jnp.float32)
    # causal mask for the generative decoder: prevent attending to future tokens
    tgt_mask_attn = jnp.triu(jnp.ones((S, S), dtype=bool), k=1)

    def init(k, shape, scale=0.1):
        return scale * jax.random.normal(k, shape, dtype=jnp.float32)

    Wq = init(keys[1], (D, D))
    Wk = init(keys[2], (D, D))
    Wv = init(keys[3], (D, D))
    Wo = init(keys[4], (D, D))
    W1 = init(keys[5], (F, D))
    b1 = init(keys[6], (F,))
    W2 = init(keys[7], (D, F))
    b2 = init(keys[8], (D,))
    g1 = 1.0 + init(keys[9], (D,), 0.05)
    be1 = init(keys[10], (D,), 0.05)
    g2 = 1.0 + init(keys[11], (D,), 0.05)
    be2 = init(keys[12], (D,), 0.05)

    params = (Wq, Wk, Wv, Wo, W1, b1, W2, b2, g1, be1, g2, be2)

    out = generative_decoder_layer(tgt, tgt_mask_attn, params)
    out = jax.block_until_ready(out)

    ref = reference(tgt, tgt_mask_attn, params)
    assert out.shape == (B, S, D)
    err = jnp.max(jnp.abs(out - ref))
    # tolerance accounts for the EUP approximate-reciprocal softmax normalizer
    assert jnp.allclose(out, ref, atol=5e-3, rtol=5e-3), f"max abs err = {err}"

    print("KERNEL_OK")
</pallas_src>

<mosaic_0001>
module attributes {stable_mosaic.version = 11 : i64} {
  func.func @decoder_layer_kernel(%arg0: i32, %arg1: memref<16x128xf32, #tpu.memory_space<vmem>>, %arg2: memref<16x16xf32, #tpu.memory_space<vmem>>, %arg3: memref<128x128xf32, #tpu.memory_space<vmem>>, %arg4: memref<32x128xf32, #tpu.memory_space<vmem>>, %arg5: memref<128x128xf32, #tpu.memory_space<vmem>>, %arg6: memref<1x128xf32, #tpu.memory_space<vmem>>, %arg7: memref<128x128xf32, #tpu.memory_space<vmem>>, %arg8: memref<1x128xf32, #tpu.memory_space<vmem>>, %arg9: memref<1x128xf32, #tpu.memory_space<vmem>>, %arg10: memref<1x128xf32, #tpu.memory_space<vmem>>, %arg11: memref<1x128xf32, #tpu.memory_space<vmem>>, %arg12: memref<1x128xf32, #tpu.memory_space<vmem>>, %arg13: memref<16x128xf32, #tpu.memory_space<vmem>>) attributes {dimension_semantics = [#tpu.dimension_semantics<arbitrary>], iteration_bounds = array<i64: 1>, scalar_prefetch = 0 : i64, scratch_operands = 0 : i64, tpu.core_type = #tpu.core_type<tc>, window_params = [{pipeline_mode = #tpu.pipeline_mode<synchronous>, transform_indices = @transform_0, window_bounds = array<i64: 16, 128>}, {pipeline_mode = #tpu.pipeline_mode<synchronous>, transform_indices = @transform_1, window_bounds = array<i64: 16, 16>}, {pipeline_mode = #tpu.pipeline_mode<synchronous>, transform_indices = @transform_2, window_bounds = array<i64: 128, 128>}, {pipeline_mode = #tpu.pipeline_mode<synchronous>, transform_indices = @transform_3, window_bounds = array<i64: 32, 128>}, {pipeline_mode = #tpu.pipeline_mode<synchronous>, transform_indices = @transform_4, window_bounds = array<i64: 128, 128>}, {pipeline_mode = #tpu.pipeline_mode<synchronous>, transform_indices = @transform_5, window_bounds = array<i64: 1, 128>}, {pipeline_mode = #tpu.pipeline_mode<synchronous>, transform_indices = @transform_6, window_bounds = array<i64: 128, 128>}, {pipeline_mode = #tpu.pipeline_mode<synchronous>, transform_indices = @transform_7, window_bounds = array<i64: 1, 128>}, {pipeline_mode = #tpu.pipeline_mode<synchronous>, transform_indices = @transform_8, window_bounds = array<i64: 1, 128>}, {pipeline_mode = #tpu.pipeline_mode<synchronous>, transform_indices = @transform_9, window_bounds = array<i64: 1, 128>}, {pipeline_mode = #tpu.pipeline_mode<synchronous>, transform_indices = @transform_10, window_bounds = array<i64: 1, 128>}, {pipeline_mode = #tpu.pipeline_mode<synchronous>, transform_indices = @transform_11, window_bounds = array<i64: 1, 128>}, {pipeline_mode = #tpu.pipeline_mode<synchronous>, transform_indices = @transform_12, window_bounds = array<i64: 16, 128>}]} {
    %c0 = arith.constant 0 : index
    %c0_0 = arith.constant 0 : index
    %0 = vector.load %arg1[%c0, %c0_0] : memref<16x128xf32, #tpu.memory_space<vmem>>, vector<16x128xf32>
    %c0_1 = arith.constant 0 : index
    %c0_2 = arith.constant 0 : index
    %1 = vector.load %arg2[%c0_1, %c0_2] : memref<16x16xf32, #tpu.memory_space<vmem>>, vector<16x16xf32>
    %c0_3 = arith.constant 0 : index
    %c0_4 = arith.constant 0 : index
    %2 = vector.load %arg3[%c0_3, %c0_4] : memref<128x128xf32, #tpu.memory_space<vmem>>, vector<128x128xf32>
    %cst = arith.constant dense<0.000000e+00> : vector<16x128xf32>
    %3 = tpu.matmul %0, %2, %cst {dimension_numbers = #tpu.dot_dimension_numbers<[1], [0], [0], [1], [0, 0, 1, 1], [], []>} : vector<16x128xf32>, vector<128x128xf32>, vector<16x128xf32> -> vector<16x128xf32>
    %4 = vector.extract_strided_slice %3 {offsets = [0, 0], sizes = [16, 8], strides = [1, 1]} : vector<16x128xf32> to vector<16x8xf32>
    %5 = vector.extract_strided_slice %3 {offsets = [0, 32], sizes = [16, 8], strides = [1, 1]} : vector<16x128xf32> to vector<16x8xf32>
    %6 = vector.extract_strided_slice %3 {offsets = [0, 64], sizes = [16, 8], strides = [1, 1]} : vector<16x128xf32> to vector<16x8xf32>
    %cst_5 = arith.constant dense<0.000000e+00> : vector<16x16xf32>
    %7 = tpu.matmul %4, %5, %cst_5 {dimension_numbers = #tpu.dot_dimension_numbers<[1], [1], [0], [0], [0, 0, 1, 0], [], []>} : vector<16x8xf32>, vector<16x8xf32>, vector<16x16xf32> -> vector<16x16xf32>
    %8 = arith.addf %7, %1 : vector<16x16xf32>
    %cst_6 = arith.constant dense<0xFF800000> : vector<16xf32>
    %9 = vector.multi_reduction <maximumf>, %8, %cst_6 [1] : vector<16x16xf32> to vector<16xf32>
    %10 = vector.shape_cast %9 : vector<16xf32> to vector<16x1xf32>
    %11 = vector.broadcast %10 : vector<16x1xf32> to vector<16x16xf32>
    %12 = arith.subf %8, %11 : vector<16x16xf32>
    %13 = math.exp %12 : vector<16x16xf32>
    %cst_7 = arith.constant dense<0.000000e+00> : vector<16xf32>
    %14 = vector.multi_reduction <add>, %13, %cst_7 [1] : vector<16x16xf32> to vector<16xf32>
    %15 = vector.shape_cast %14 : vector<16xf32> to vector<16x1xf32>
    %16 = tpu.reciprocal %15 {approx = true} : vector<16x1xf32> -> vector<16x1xf32>
    %17 = vector.broadcast %16 : vector<16x1xf32> to vector<16x16xf32>
    %18 = arith.mulf %13, %17 : vector<16x16xf32>
    %cst_8 = arith.constant dense<0.000000e+00> : vector<16x8xf32>
    %19 = tpu.matmul %18, %6, %cst_8 {dimension_numbers = #tpu.dot_dimension_numbers<[1], [0], [0], [1], [0, 0, 1, 1], [], []>} : vector<16x16xf32>, vector<16x8xf32>, vector<16x8xf32> -> vector<16x8xf32>
    %20 = vector.extract_strided_slice %3 {offsets = [0, 8], sizes = [16, 8], strides = [1, 1]} : vector<16x128xf32> to vector<16x8xf32>
    %21 = vector.extract_strided_slice %3 {offsets = [0, 40], sizes = [16, 8], strides = [1, 1]} : vector<16x128xf32> to vector<16x8xf32>
    %22 = vector.extract_strided_slice %3 {offsets = [0, 72], sizes = [16, 8], strides = [1, 1]} : vector<16x128xf32> to vector<16x8xf32>
    %cst_9 = arith.constant dense<0.000000e+00> : vector<16x16xf32>
    %23 = tpu.matmul %20, %21, %cst_9 {dimension_numbers = #tpu.dot_dimension_numbers<[1], [1], [0], [0], [0, 0, 1, 0], [], []>} : vector<16x8xf32>, vector<16x8xf32>, vector<16x16xf32> -> vector<16x16xf32>
    %24 = arith.addf %23, %1 : vector<16x16xf32>
    %cst_10 = arith.constant dense<0xFF800000> : vector<16xf32>
    %25 = vector.multi_reduction <maximumf>, %24, %cst_10 [1] : vector<16x16xf32> to vector<16xf32>
    %26 = vector.shape_cast %25 : vector<16xf32> to vector<16x1xf32>
    %27 = vector.broadcast %26 : vector<16x1xf32> to vector<16x16xf32>
    %28 = arith.subf %24, %27 : vector<16x16xf32>
    %29 = math.exp %28 : vector<16x16xf32>
    %cst_11 = arith.constant dense<0.000000e+00> : vector<16xf32>
    %30 = vector.multi_reduction <add>, %29, %cst_11 [1] : vector<16x16xf32> to vector<16xf32>
    %31 = vector.shape_cast %30 : vector<16xf32> to vector<16x1xf32>
    %32 = tpu.reciprocal %31 {approx = true} : vector<16x1xf32> -> vector<16x1xf32>
    %33 = vector.broadcast %32 : vector<16x1xf32> to vector<16x16xf32>
    %34 = arith.mulf %29, %33 : vector<16x16xf32>
    %cst_12 = arith.constant dense<0.000000e+00> : vector<16x8xf32>
    %35 = tpu.matmul %34, %22, %cst_12 {dimension_numbers = #tpu.dot_dimension_numbers<[1], [0], [0], [1], [0, 0, 1, 1], [], []>} : vector<16x16xf32>, vector<16x8xf32>, vector<16x8xf32> -> vector<16x8xf32>
    %36 = vector.extract_strided_slice %3 {offsets = [0, 16], sizes = [16, 8], strides = [1, 1]} : vector<16x128xf32> to vector<16x8xf32>
    %37 = vector.extract_strided_slice %3 {offsets = [0, 48], sizes = [16, 8], strides = [1, 1]} : vector<16x128xf32> to vector<16x8xf32>
    %38 = vector.extract_strided_slice %3 {offsets = [0, 80], sizes = [16, 8], strides = [1, 1]} : vector<16x128xf32> to vector<16x8xf32>
    %cst_13 = arith.constant dense<0.000000e+00> : vector<16x16xf32>
    %39 = tpu.matmul %36, %37, %cst_13 {dimension_numbers = #tpu.dot_dimension_numbers<[1], [1], [0], [0], [0, 0, 1, 0], [], []>} : vector<16x8xf32>, vector<16x8xf32>, vector<16x16xf32> -> vector<16x16xf32>
    %40 = arith.addf %39, %1 : vector<16x16xf32>
    %cst_14 = arith.constant dense<0xFF800000> : vector<16xf32>
    %41 = vector.multi_reduction <maximumf>, %40, %cst_14 [1] : vector<16x16xf32> to vector<16xf32>
    %42 = vector.shape_cast %41 : vector<16xf32> to vector<16x1xf32>
    %43 = vector.broadcast %42 : vector<16x1xf32> to vector<16x16xf32>
    %44 = arith.subf %40, %43 : vector<16x16xf32>
    %45 = math.exp %44 : vector<16x16xf32>
    %cst_15 = arith.constant dense<0.000000e+00> : vector<16xf32>
    %46 = vector.multi_reduction <add>, %45, %cst_15 [1] : vector<16x16xf32> to vector<16xf32>
    %47 = vector.shape_cast %46 : vector<16xf32> to vector<16x1xf32>
    %48 = tpu.reciprocal %47 {approx = true} : vector<16x1xf32> -> vector<16x1xf32>
    %49 = vector.broadcast %48 : vector<16x1xf32> to vector<16x16xf32>
    %50 = arith.mulf %45, %49 : vector<16x16xf32>
    %cst_16 = arith.constant dense<0.000000e+00> : vector<16x8xf32>
    %51 = tpu.matmul %50, %38, %cst_16 {dimension_numbers = #tpu.dot_dimension_numbers<[1], [0], [0], [1], [0, 0, 1, 1], [], []>} : vector<16x16xf32>, vector<16x8xf32>, vector<16x8xf32> -> vector<16x8xf32>
    %52 = vector.extract_strided_slice %3 {offsets = [0, 24], sizes = [16, 8], strides = [1, 1]} : vector<16x128xf32> to vector<16x8xf32>
    %53 = vector.extract_strided_slice %3 {offsets = [0, 56], sizes = [16, 8], strides = [1, 1]} : vector<16x128xf32> to vector<16x8xf32>
    %54 = vector.extract_strided_slice %3 {offsets = [0, 88], sizes = [16, 8], strides = [1, 1]} : vector<16x128xf32> to vector<16x8xf32>
    %cst_17 = arith.constant dense<0.000000e+00> : vector<16x16xf32>
    %55 = tpu.matmul %52, %53, %cst_17 {dimension_numbers = #tpu.dot_dimension_numbers<[1], [1], [0], [0], [0, 0, 1, 0], [], []>} : vector<16x8xf32>, vector<16x8xf32>, vector<16x16xf32> -> vector<16x16xf32>
    %56 = arith.addf %55, %1 : vector<16x16xf32>
    %cst_18 = arith.constant dense<0xFF800000> : vector<16xf32>
    %57 = vector.multi_reduction <maximumf>, %56, %cst_18 [1] : vector<16x16xf32> to vector<16xf32>
    %58 = vector.shape_cast %57 : vector<16xf32> to vector<16x1xf32>
    %59 = vector.broadcast %58 : vector<16x1xf32> to vector<16x16xf32>
    %60 = arith.subf %56, %59 : vector<16x16xf32>
    %61 = math.exp %60 : vector<16x16xf32>
    %cst_19 = arith.constant dense<0.000000e+00> : vector<16xf32>
    %62 = vector.multi_reduction <add>, %61, %cst_19 [1] : vector<16x16xf32> to vector<16xf32>
    %63 = vector.shape_cast %62 : vector<16xf32> to vector<16x1xf32>
    %64 = tpu.reciprocal %63 {approx = true} : vector<16x1xf32> -> vector<16x1xf32>
    %65 = vector.broadcast %64 : vector<16x1xf32> to vector<16x16xf32>
    %66 = arith.mulf %61, %65 : vector<16x16xf32>
    %cst_20 = arith.constant dense<0.000000e+00> : vector<16x8xf32>
    %67 = tpu.matmul %66, %54, %cst_20 {dimension_numbers = #tpu.dot_dimension_numbers<[1], [0], [0], [1], [0, 0, 1, 1], [], []>} : vector<16x16xf32>, vector<16x8xf32>, vector<16x8xf32> -> vector<16x8xf32>
    %68 = tpu.concatenate %19, %35, %51, %67 in 1 : vector<16x8xf32>, vector<16x8xf32>, vector<16x8xf32>, vector<16x8xf32> -> vector<16x32xf32>
    %c0_21 = arith.constant 0 : index
    %c0_22 = arith.constant 0 : index
    %69 = vector.load %arg4[%c0_21, %c0_22] : memref<32x128xf32, #tpu.memory_space<vmem>>, vector<32x128xf32>
    %cst_23 = arith.constant dense<0.000000e+00> : vector<16x128xf32>
    %70 = tpu.matmul %68, %69, %cst_23 {dimension_numbers = #tpu.dot_dimension_numbers<[1], [0], [0], [1], [0, 0, 1, 1], [], []>} : vector<16x32xf32>, vector<32x128xf32>, vector<16x128xf32> -> vector<16x128xf32>
    %71 = tpu.iota {dimensions = array<i32: 1>} : vector<16x128xi32>
    %c32_i32 = arith.constant 32 : i32
    %72 = vector.broadcast %c32_i32 : i32 to vector<16x128xi32>
    %73 = arith.cmpi slt, %71, %72 : vector<16x128xi32>
    %74 = arith.addf %0, %70 : vector<16x128xf32>
    %c0_24 = arith.constant 0 : index
    %c0_25 = arith.constant 0 : index
    %75 = vector.load %arg9[%c0_24, %c0_25] : memref<1x128xf32, #tpu.memory_space<vmem>>, vector<1x128xf32>
    %c0_26 = arith.constant 0 : index
    %c0_27 = arith.constant 0 : index
    %76 = vector.load %arg10[%c0_26, %c0_27] : memref<1x128xf32, #tpu.memory_space<vmem>>, vector<1x128xf32>
    %cst_28 = arith.constant dense<0.000000e+00> : vector<16xf32>
    %77 = vector.multi_reduction <add>, %74, %cst_28 [1] : vector<16x128xf32> to vector<16xf32>
    %78 = vector.shape_cast %77 : vector<16xf32> to vector<16x1xf32>
    %cst_29 = arith.constant 3.125000e-02 : f32
    %79 = vector.broadcast %cst_29 : f32 to vector<16x1xf32>
    %80 = arith.mulf %78, %79 : vector<16x1xf32>
    %81 = vector.broadcast %80 : vector<16x1xf32> to vector<16x128xf32>
    %82 = arith.subf %74, %81 : vector<16x128xf32>
    %cst_30 = arith.constant 0.000000e+00 : f32
    %83 = vector.broadcast %cst_30 : f32 to vector<16x128xf32>
    %84 = arith.select %73, %82, %83 : vector<16x128xi1>, vector<16x128xf32>
    %85 = arith.mulf %84, %84 : vector<16x128xf32>
    %cst_31 = arith.constant dense<0.000000e+00> : vector<16xf32>
    %86 = vector.multi_reduction <add>, %85, %cst_31 [1] : vector<16x128xf32> to vector<16xf32>
    %87 = vector.shape_cast %86 : vector<16xf32> to vector<16x1xf32>
    %cst_32 = arith.constant 3.125000e-02 : f32
    %88 = vector.broadcast %cst_32 : f32 to vector<16x1xf32>
    %89 = arith.mulf %87, %88 : vector<16x1xf32>
    %cst_33 = arith.constant 9.99999974E-6 : f32
    %90 = vector.broadcast %cst_33 : f32 to vector<16x1xf32>
    %91 = arith.addf %89, %90 : vector<16x1xf32>
    %92 = math.rsqrt %91 : vector<16x1xf32>
    %93 = vector.broadcast %92 : vector<16x1xf32> to vector<16x128xf32>
    %94 = arith.mulf %84, %93 : vector<16x128xf32>
    %95 = vector.broadcast %75 : vector<1x128xf32> to vector<16x128xf32>
    %96 = arith.mulf %94, %95 : vector<16x128xf32>
    %97 = vector.broadcast %76 : vector<1x128xf32> to vector<16x128xf32>
    %98 = arith.addf %96, %97 : vector<16x128xf32>
    %c0_34 = arith.constant 0 : index
    %c0_35 = arith.constant 0 : index
    %99 = vector.load %arg5[%c0_34, %c0_35] : memref<128x128xf32, #tpu.memory_space<vmem>>, vector<128x128xf32>
    %cst_36 = arith.constant dense<0.000000e+00> : vector<16x128xf32>
    %100 = tpu.matmul %98, %99, %cst_36 {dimension_numbers = #tpu.dot_dimension_numbers<[1], [0], [0], [1], [0, 0, 1, 1], [], []>} : vector<16x128xf32>, vector<128x128xf32>, vector<16x128xf32> -> vector<16x128xf32>
    %c0_37 = arith.constant 0 : index
    %c0_38 = arith.constant 0 : index
    %101 = vector.load %arg6[%c0_37, %c0_38] : memref<1x128xf32, #tpu.memory_space<vmem>>, vector<1x128xf32>
    %102 = vector.broadcast %101 : vector<1x128xf32> to vector<16x128xf32>
    %103 = arith.addf %100, %102 : vector<16x128xf32>
    %cst_39 = arith.constant 0.000000e+00 : f32
    %104 = vector.broadcast %cst_39 : f32 to vector<16x128xf32>
    %105 = arith.maximumf %103, %104 : vector<16x128xf32>
    %c0_40 = arith.constant 0 : index
    %c0_41 = arith.constant 0 : index
    %106 = vector.load %arg7[%c0_40, %c0_41] : memref<128x128xf32, #tpu.memory_space<vmem>>, vector<128x128xf32>
    %cst_42 = arith.constant dense<0.000000e+00> : vector<16x128xf32>
    %107 = tpu.matmul %105, %106, %cst_42 {dimension_numbers = #tpu.dot_dimension_numbers<[1], [0], [0], [1], [0, 0, 1, 1], [], []>} : vector<16x128xf32>, vector<128x128xf32>, vector<16x128xf32> -> vector<16x128xf32>
    %c0_43 = arith.constant 0 : index
    %c0_44 = arith.constant 0 : index
    %108 = vector.load %arg8[%c0_43, %c0_44] : memref<1x128xf32, #tpu.memory_space<vmem>>, vector<1x128xf32>
    %109 = vector.broadcast %108 : vector<1x128xf32> to vector<16x128xf32>
    %110 = arith.addf %107, %109 : vector<16x128xf32>
    %111 = arith.addf %98, %110 : vector<16x128xf32>
    %c0_45 = arith.constant 0 : index
    %c0_46 = arith.constant 0 : index
    %112 = vector.load %arg11[%c0_45, %c0_46] : memref<1x128xf32, #tpu.memory_space<vmem>>, vector<1x128xf32>
    %c0_47 = arith.constant 0 : index
    %c0_48 = arith.constant 0 : index
    %113 = vector.load %arg12[%c0_47, %c0_48] : memref<1x128xf32, #tpu.memory_space<vmem>>, vector<1x128xf32>
    %cst_49 = arith.constant dense<0.000000e+00> : vector<16xf32>
    %114 = vector.multi_reduction <add>, %111, %cst_49 [1] : vector<16x128xf32> to vector<16xf32>
    %115 = vector.shape_cast %114 : vector<16xf32> to vector<16x1xf32>
    %cst_50 = arith.constant 3.125000e-02 : f32
    %116 = vector.broadcast %cst_50 : f32 to vector<16x1xf32>
    %117 = arith.mulf %115, %116 : vector<16x1xf32>
    %118 = vector.broadcast %117 : vector<16x1xf32> to vector<16x128xf32>
    %119 = arith.subf %111, %118 : vector<16x128xf32>
    %cst_51 = arith.constant 0.000000e+00 : f32
    %120 = vector.broadcast %cst_51 : f32 to vector<16x128xf32>
    %121 = arith.select %73, %119, %120 : vector<16x128xi1>, vector<16x128xf32>
    %122 = arith.mulf %121, %121 : vector<16x128xf32>
    %cst_52 = arith.constant dense<0.000000e+00> : vector<16xf32>
    %123 = vector.multi_reduction <add>, %122, %cst_52 [1] : vector<16x128xf32> to vector<16xf32>
    %124 = vector.shape_cast %123 : vector<16xf32> to vector<16x1xf32>
    %cst_53 = arith.constant 3.125000e-02 : f32
    %125 = vector.broadcast %cst_53 : f32 to vector<16x1xf32>
    %126 = arith.mulf %124, %125 : vector<16x1xf32>
    %cst_54 = arith.constant 9.99999974E-6 : f32
    %127 = vector.broadcast %cst_54 : f32 to vector<16x1xf32>
    %128 = arith.addf %126, %127 : vector<16x1xf32>
    %129 = math.rsqrt %128 : vector<16x1xf32>
    %130 = vector.broadcast %129 : vector<16x1xf32> to vector<16x128xf32>
    %131 = arith.mulf %121, %130 : vector<16x128xf32>
    %132 = vector.broadcast %112 : vector<1x128xf32> to vector<16x128xf32>
    %133 = arith.mulf %131, %132 : vector<16x128xf32>
    %134 = vector.broadcast %113 : vector<1x128xf32> to vector<16x128xf32>
    %135 = arith.addf %133, %134 : vector<16x128xf32>
    %c0_55 = arith.constant 0 : index
    %c0_56 = arith.constant 0 : index
    %136 = vector.load %arg13[%c0_55, %c0_56] : memref<16x128xf32, #tpu.memory_space<vmem>>, vector<16x128xf32>
    tpu.vector_store %arg13[%c0_55, %c0_56], %135 {strides = array<i32>} : memref<16x128xf32, #tpu.memory_space<vmem>>, vector<16x128xf32>,
    return
  }
  func.func @transform_0(%arg0: i32) -> (i32, i32) {
    %c0_i32 = arith.constant 0 : i32
    %c0_i32_0 = arith.constant 0 : i32
    %c0_i32_1 = arith.constant 0 : i32
    return %c0_i32, %c0_i32_0 : i32, i32
  }
  func.func @transform_1(%arg0: i32) -> (i32, i32) {
    %c0_i32 = arith.constant 0 : i32
    %c0_i32_0 = arith.constant 0 : i32
    %c0_i32_1 = arith.constant 0 : i32
    return %c0_i32, %c0_i32_0 : i32, i32
  }
  func.func @transform_2(%arg0: i32) -> (i32, i32) {
    %c0_i32 = arith.constant 0 : i32
    %c0_i32_0 = arith.constant 0 : i32
    %c0_i32_1 = arith.constant 0 : i32
    return %c0_i32, %c0_i32_0 : i32, i32
  }
  func.func @transform_3(%arg0: i32) -> (i32, i32) {
    %c0_i32 = arith.constant 0 : i32
    %c0_i32_0 = arith.constant 0 : i32
    %c0_i32_1 = arith.constant 0 : i32
    return %c0_i32, %c0_i32_0 : i32, i32
  }
  func.func @transform_4(%arg0: i32) -> (i32, i32) {
    %c0_i32 = arith.constant 0 : i32
    %c0_i32_0 = arith.constant 0 : i32
    %c0_i32_1 = arith.constant 0 : i32
    return %c0_i32, %c0_i32_0 : i32, i32
  }
  func.func @transform_5(%arg0: i32) -> (i32, i32) {
    %c0_i32 = arith.constant 0 : i32
    %c0_i32_0 = arith.constant 0 : i32
    %c0_i32_1 = arith.constant 0 : i32
    return %c0_i32, %c0_i32_0 : i32, i32
  }
  func.func @transform_6(%arg0: i32) -> (i32, i32) {
    %c0_i32 = arith.constant 0 : i32
    %c0_i32_0 = arith.constant 0 : i32
    %c0_i32_1 = arith.constant 0 : i32
    return %c0_i32, %c0_i32_0 : i32, i32
  }
  func.func @transform_7(%arg0: i32) -> (i32, i32) {
    %c0_i32 = arith.constant 0 : i32
    %c0_i32_0 = arith.constant 0 : i32
    %c0_i32_1 = arith.constant 0 : i32
    return %c0_i32, %c0_i32_0 : i32, i32
  }
  func.func @transform_8(%arg0: i32) -> (i32, i32) {
    %c0_i32 = arith.constant 0 : i32
    %c0_i32_0 = arith.constant 0 : i32
    %c0_i32_1 = arith.constant 0 : i32
    return %c0_i32, %c0_i32_0 : i32, i32
  }
  func.func @transform_9(%arg0: i32) -> (i32, i32) {
    %c0_i32 = arith.constant 0 : i32
    %c0_i32_0 = arith.constant 0 : i32
    %c0_i32_1 = arith.constant 0 : i32
    return %c0_i32, %c0_i32_0 : i32, i32
  }
  func.func @transform_10(%arg0: i32) -> (i32, i32) {
    %c0_i32 = arith.constant 0 : i32
    %c0_i32_0 = arith.constant 0 : i32
    %c0_i32_1 = arith.constant 0 : i32
    return %c0_i32, %c0_i32_0 : i32, i32
  }
  func.func @transform_11(%arg0: i32) -> (i32, i32) {
    %c0_i32 = arith.constant 0 : i32
    %c0_i32_0 = arith.constant 0 : i32
    %c0_i32_1 = arith.constant 0 : i32
    return %c0_i32, %c0_i32_0 : i32, i32
  }
  func.func @transform_12(%arg0: i32) -> (i32, i32) {
    %c0_i32 = arith.constant 0 : i32
    %c0_i32_0 = arith.constant 0 : i32
    %c0_i32_1 = arith.constant 0 : i32
    return %c0_i32, %c0_i32_0 : i32, i32
  }
}

</mosaic_0001>

<bundles_post_ra>
// kernel: tpu_custom_call.1
= control target key start
LH: loop header
LB: loop body
LE: loop exit
PB: predicated region body
PF: predicated region fallthrough
CT: control target
= control target key end

     0   :  { %17 = vsyncpa [#allocation3], 0  ;;  %s2521_s0 = inlined_call_operand.hbm [shape: f32[16,128], index: 0, kind: input, shape index: {}]   ;;  %s2522_s1 = inlined_call_operand.hbm [shape: f32[16,16], index: 1, kind: input, shape index: {}]   ;;  %s2523_s2 = inlined_call_operand.hbm [shape: f32[128,128], index: 2, kind: input, shape index: {}]   ;;  %s2524_s3 = inlined_call_operand.hbm [shape: f32[32,128], index: 3, kind: input, shape index: {}]   ;;  %s2525_s4 = inlined_call_operand.hbm [shape: f32[128,128], index: 4, kind: input, shape index: {}]   ;;  %s2526_s5 = inlined_call_operand.vmem [shape: f32[1,128], index: 5, kind: input, shape index: {}]   ;;  %s2527_s6 = inlined_call_operand.hbm [shape: f32[128,128], index: 6, kind: input, shape index: {}]   ;;  %s2528_s7 = inlined_call_operand.vmem [shape: f32[1,128], index: 7, kind: input, shape index: {}]   ;;  %s2529_s8 = inlined_call_operand.vmem [shape: f32[1,128], index: 8, kind: input, shape index: {}]   ;;  %s2530_s9 = inlined_call_operand.vmem [shape: f32[1,128], index: 9, kind: input, shape index: {}]   ;;  %s2531_s10 = inlined_call_operand.vmem [shape: f32[1,128], index: 10, kind: input, shape index: {}]   ;;  %s2532_s11 = inlined_call_operand.vmem [shape: f32[1,128], index: 11, kind: input, shape index: {}]   ;;  %s2533_s12 = inlined_call_operand.hbm [shape: f32[16,128], index: 12, kind: output, shape index: {}]  }
   0x1   :  { %18 = vsyncpa [#allocation6], 0 }
   0x2   :  { %19 = vsyncpa [#allocation9], 0 }
   0x3   :  { %20 = vsyncpa [#allocation12], 0 }
   0x4   :  { %21 = vsyncpa [#allocation4], 0  ;;  %s2153_s21 = smov [#allocation5]   ;;  %s2154_s23 = smov [#allocation8]  }
   0x5   :  { %s39_s22 = sshll.u32 %s2153_s21, 4  ;;  %s63_s24 = sshll.u32 %s2154_s23, 4  ;;  %s40_s22 = int_to_ptr.vmem [resolvable:$true] %s39_s22  ;;  %s2240_s24 = int_to_ptr.vmem [resolvable:$true] %s63_s24 }
   0x6   :  { %s1989_s27 = scalar_lea.hbm %s2522_s1, 256 }
   0x7   :  { %p1990_p0 = scmp.ne.s32.totalorder %s2522_s1, %s1989_s27  ;;  %p1993_p1 = scmp.lt.u32.totalorder %s1989_s27, %s2522_s1 }
   0x9   :  { %p1995_p2 = pnand %p1993_p1, %p1990_p0 }
   0xb   :  { %1998 = shalt.err (!%p1995_p2)
}
   0xc   :  { %s1999_s14 = scalar_lea.vmem %s40_s22, 256  ;;  %p2004_p4 = scmp.lt.s32.totalorder %s40_s22, %s40_s22 }
   0xd   :  { %p2000_p3 = scmp.ne.s32.totalorder %s40_s22, %s1999_s14  ;;  %p2005_p5 = scmp.lt.s32.totalorder %s1999_s14, %s1999_s14 }
   0xf   :  { %p2006_p6 = por %p2005_p5, %p2004_p4 }
  0x11   :  { %p2007_p7 = pnand %p2006_p6, %p2000_p3 }
  0x13   :  { %2010 = shalt.err (!%p2007_p7)
}
  0x14   :  { %s2155_s15 = smov 128   ;;  %s2156_s16 = smov 8  }
  0x15   :  { %45 = dma.hbm_to_vmem [thread:$0]  %s2522_s1, 256, %s40_s22, [#allocation6], %s2155_s15, %s2155_s15, %s2156_s16  }
  0x16   :  { %s2011_s21 = scalar_lea.hbm %s2524_s3, 512 }
  0x17   :  { %p2012_p8 = scmp.ne.s32.totalorder %s2524_s3, %s2011_s21  ;;  %p2015_p9 = scmp.lt.u32.totalorder %s2011_s21, %s2524_s3 }
  0x19   :  { %p2017_p10 = pnand %p2015_p9, %p2012_p8 }
  0x1b   :  { %2020 = shalt.err (!%p2017_p10)
}
  0x1c   :  { %s2021_s28 = scalar_lea.vmem %s2240_s24, 512  ;;  %p2026_p12 = scmp.lt.s32.totalorder %s2240_s24, %s2240_s24 }
  0x1d   :  { %p2022_p11 = scmp.ne.s32.totalorder %s2240_s24, %s2021_s28  ;;  %p2027_p13 = scmp.lt.s32.totalorder %s2021_s28, %s2021_s28 }
  0x1f   :  { %p2028_p0 = por %p2027_p13, %p2026_p12 }
  0x21   :  { %p2029_p1 = pnand %p2028_p0, %p2022_p11 }
  0x23   :  { %2032 = shalt.err (!%p2029_p1)
}
  0x24   :  { %69 = dma.hbm_to_vmem [thread:$0]  %s2524_s3, 512, %s2240_s24, [#allocation9], %s2155_s15, %s2155_s15, %s2156_s16  }
  0x25   :  { %s2157_s29 = smov [#allocation2]   ;;  %s2158_s13 = smov [#allocation7]  }
  0x26   :  { %s27_s30 = sshll.u32 %s2157_s29, 4  ;;  %s51_s14 = sshll.u32 %s2158_s13, 4  ;;  %s28_s30 = int_to_ptr.vmem [resolvable:$true] %s27_s30  ;;  %s2277_s14 = int_to_ptr.vmem [resolvable:$true] %s51_s14 }
  0x27   :  { %s2033_s19 = scalar_lea.hbm %s2521_s0, 256 }
  0x28   :  { %p2034_p2 = scmp.ne.s32.totalorder %s2521_s0, %s2033_s19  ;;  %p2037_p3 = scmp.lt.u32.totalorder %s2033_s19, %s2521_s0 }
  0x2a   :  { %p2039_p4 = pnand %p2037_p3, %p2034_p2 }
  0x2c   :  { %2042 = shalt.err (!%p2039_p4)
}
  0x2d   :  { %s2043_s3 = scalar_lea.vmem %s28_s30, 256  ;;  %p2048_p6 = scmp.lt.s32.totalorder %s28_s30, %s28_s30 }
  0x2e   :  { %p2044_p5 = scmp.ne.s32.totalorder %s28_s30, %s2043_s3  ;;  %p2049_p7 = scmp.lt.s32.totalorder %s2043_s3, %s2043_s3 }
  0x30   :  { %p2050_p8 = por %p2049_p7, %p2048_p6 }
  0x32   :  { %p2051_p9 = pnand %p2050_p8, %p2044_p5 }
  0x34   :  { %2054 = shalt.err (!%p2051_p9)
}
  0x35   :  { %33 = dma.hbm_to_vmem [thread:$0]  %s2521_s0, 256, %s28_s30, [#allocation3], %s2155_s15, %s2155_s15, %s2156_s16  }
  0x36   :  { %s2055_s1 = scalar_lea.hbm %s2523_s2, 2048 }
  0x37   :  { %p2056_p10 = scmp.ne.s32.totalorder %s2523_s2, %s2055_s1  ;;  %p2059_p11 = scmp.lt.u32.totalorder %s2055_s1, %s2523_s2 }
  0x39   :  { %p2061_p12 = pnand %p2059_p11, %p2056_p10 }
  0x3b   :  { %2064 = shalt.err (!%p2061_p12)
}
  0x3c   :  { %s2065_s18 = scalar_lea.vmem %s2277_s14, 2048  ;;  %p2070_p0 = scmp.lt.s32.totalorder %s2277_s14, %s2277_s14 }
  0x3d   :  { %p2066_p13 = scmp.ne.s32.totalorder %s2277_s14, %s2065_s18  ;;  %p2071_p1 = scmp.lt.s32.totalorder %s2065_s18, %s2065_s18 }
  0x3f   :  { %p2072_p2 = por %p2071_p1, %p2070_p0 }
  0x41   :  { %p2073_p3 = pnand %p2072_p2, %p2066_p13 }
  0x43   :  { %2076 = shalt.err (!%p2073_p3)
}
  0x44   :  { %57 = dma.hbm_to_vmem [thread:$0]  %s2523_s2, 2048, %s2277_s14, [#allocation6], %s2155_s15, %s2155_s15, %s2156_s16  }
  0x45   :  { %s2159_s19 = smov [#allocation10]   ;;  %s2160_s21 = smov [#allocation11]  }
  0x46   :  { %s75_s20 = sshll.u32 %s2159_s19, 4  ;;  %s89_s23 = sshll.u32 %s2160_s21, 4  ;;  %s76_s20 = int_to_ptr.vmem [resolvable:$true] %s75_s20  ;;  %s2314_s23 = int_to_ptr.vmem [resolvable:$true] %s89_s23 }
  0x47   :  { %s2077_s24 = scalar_lea.hbm %s2525_s4, 2048 }
  0x48   :  { %p2078_p4 = scmp.ne.s32.totalorder %s2525_s4, %s2077_s24  ;;  %p2081_p5 = scmp.lt.u32.totalorder %s2077_s24, %s2525_s4 }
  0x4a   :  { %p2083_p6 = pnand %p2081_p5, %p2078_p4 }
  0x4c   :  { %2086 = shalt.err (!%p2083_p6)
}
  0x4d   :  { %s2087_s2 = scalar_lea.vmem %s76_s20, 2048  ;;  %p2092_p8 = scmp.lt.s32.totalorder %s76_s20, %s76_s20 }
  0x4e   :  { %p2088_p7 = scmp.ne.s32.totalorder %s76_s20, %s2087_s2  ;;  %p2093_p9 = scmp.lt.s32.totalorder %s2087_s2, %s2087_s2 }
  0x50   :  { %p2094_p10 = por %p2093_p9, %p2092_p8 }
  0x52   :  { %p2095_p11 = pnand %p2094_p10, %p2088_p7 }
  0x54   :  { %2098 = shalt.err (!%p2095_p11)
}
  0x55   :  { %81 = dma.hbm_to_vmem [thread:$0]  %s2525_s4, 2048, %s76_s20, [#allocation9], %s2155_s15, %s2155_s15, %s2156_s16  }
  0x56   :  { %s2099_s17 = scalar_lea.hbm %s2527_s6, 2048 }
  0x57   :  { %p2100_p12 = scmp.ne.s32.totalorder %s2527_s6, %s2099_s17  ;;  %p2103_p13 = scmp.lt.u32.totalorder %s2099_s17, %s2527_s6 }
  0x59   :  { %p2105_p0 = pnand %p2103_p13, %p2100_p12 }
  0x5b   :  { %2108 = shalt.err (!%p2105_p0)
}
  0x5c   :  { %s2109_s21 = scalar_lea.vmem %s2314_s23, 2048  ;;  %p2114_p2 = scmp.lt.s32.totalorder %s2314_s23, %s2314_s23 }
  0x5d   :  { %p2110_p1 = scmp.ne.s32.totalorder %s2314_s23, %s2109_s21  ;;  %p2115_p3 = scmp.lt.s32.totalorder %s2109_s21, %s2109_s21 }
  0x5f   :  { %p2116_p4 = por %p2115_p3, %p2114_p2 }
  0x61   :  { %p2117_p5 = pnand %p2116_p4, %p2110_p1 }
  0x63   :  { %2120 = shalt.err (!%p2117_p5)
}
  0x64   :  { %95 = dma.hbm_to_vmem [thread:$0]  %s2527_s6, 2048, %s2314_s23, [#allocation12], %s2155_s15, %s2155_s15, %s2156_s16  }
  0x65   :  { %2143 = dma.done.wait [#allocation3], 256  }
  0x66   :  { %2144 = vsyncadd [#allocation3], 4294967040 }
  0x67   :  { %2145 = dma.done.wait [#allocation6], 2304  }
  0x68   :  { %2146 = vsyncadd [#allocation6], 4294964992 }
  0x69   :  { %2147 = dma.done.wait [#allocation9], 2560  }
  0x6a   :  { %2148 = vsyncadd [#allocation9], 4294964736 }
  0x6b   :  { %2149 = dma.done.wait [#allocation12], 2048  }
  0x6c   :  { %2150 = vsyncadd [#allocation12], 4294965248  ;;  %v128_v0 = vld [vmem:[#allocation7] sm:$0xff]  ;;  %v129_v1 = vld [vmem:[#allocation7 + $0x8] sm:$0xff]  ;;  %vm225_vm0 = vcmask 64512   ;;  %s2161_s6 = smov 96  }
  0x6d   :  { %v130_v2 = vld [vmem:[#allocation7 + $0x10] sm:$0xff]  ;;  %v1743_v3 = vpack.c.bf16 %v129_v1, %v128_v0  ;;  %v131_v4 = vld [vmem:[#allocation7 + $0x18] sm:$0xff]  ;;  %v132_v6 = vld [vmem:[#allocation7 + $0x20] sm:$0xff]  ;;  %vm309_vm2 = vcmask 130048   ;;  %s2162_s23 = smov 64   ;;  %s2163_s25 = smov 88  }
  0x6e   :  { %v1747_v5 = vpack.c.bf16 %v131_v4, %v130_v2  ;;  %v133_v7 = vld [vmem:[#allocation7 + $0x28] sm:$0xff]  ;;  %v2351_v9 = vld [vmem:[#allocation2] sm:$0xff]  ;;  %v134_v10 = vld [vmem:[#allocation7 + $0x30] sm:$0xff]  ;;  %s2164_s3 = smov 120   ;;  %s2165_s24 = smov 56   ;;  %vm1047_vm3 = vcmask 195584  }
  0x6f   :  { %1744 = vmatprep.subr.bf16.mxu0 %v1743_v3  ;;  %v1751_v8 = vpack.c.bf16 %v133_v7, %v132_v6  ;;  %v135_v11 = vld [vmem:[#allocation7 + $0x38] sm:$0xff]  ;;  %1603 = vmatprep.mubr.f32.mxu0 %v2351_v9  ;;  %v136_v13 = vld [vmem:[#allocation7 + $0x40] sm:$0xff]  ;;  %v137_v14 = vld [vmem:[#allocation7 + $0x48] sm:$0xff]  ;;  %s2166_s26 = smov 80   ;;  %s2167_s27 = smov 112   ;;  %vm1054_vm4 = vcmask 261120  }
  0x70   :  { %1746 = vmatpush3.bf16.msra.mxu0 %v1743_v3  ;;  %v1755_v12 = vpack.c.bf16 %v135_v11, %v134_v10  ;;  %v1759_v15 = vpack.c.bf16 %v137_v14, %v136_v13  ;;  %v138_v16 = vld [vmem:[#allocation7 + $0x50] sm:$0xff]  ;;  %v139_v17 = vld [vmem:[#allocation7 + $0x58] sm:$0xff]  ;;  %v140_v19 = vld [vmem:[#allocation7 + $0x60] sm:$0xff]  ;;  %s2168_s28 = smov 72   ;;  %s2169_s1 = smov 104  }
  0x71   :  { %1748 = vmatprep.subr.bf16.mxu0 %v1747_v5  ;;  %v1763_v18 = vpack.c.bf16 %v139_v17, %v138_v16  ;;  %v141_v20 = vld [vmem:[#allocation7 + $0x68] sm:$0xff]  ;;  %v142_v22 = vld [vmem:[#allocation7 + $0x70] sm:$0xff]  ;;  %v143_v23 = vld [vmem:[#allocation7 + $0x78] sm:$0xff]  ;;  %s2170_s2 = smov 48   ;;  %s2171_s14 = smov 40  }
  0x72   :  { %v1767_v21 = vpack.c.bf16 %v141_v20, %v140_v19  ;;  %v1771_v24 = vpack.c.bf16 %v143_v23, %v142_v22  ;;  %v2354_v25 = vld [vmem:[#allocation2 + $0x8] sm:$0xff]  ;;  %vm2370_vm1 = vmpackc.low %vm225_vm0, %vm225_vm0  ;;  %v2380_v34 = vld [vmem:[#allocation5 + $0x8] sm:$0xff]  ;;  %s2172_s22 = smov 16   ;;  %s2173_s29 = smov 24  }
  0x73   :  { %v2382_v35 = vld [vmem:[#allocation5] sm:$0xff]  ;;  %s2174_s20 = smov [#allocation13]  }
  0x74   :  { %1750 = vmatpush3.bf16.msra.mxu0 %v1747_v5 }
  0x75   :  { %1752 = vmatprep.subr.bf16.mxu0 %v1751_v8 }
  0x78   :  { %1754 = vmatpush3.bf16.msra.mxu0 %v1751_v8 }
  0x79   :  { %1756 = vmatprep.subr.bf16.mxu0 %v1755_v12 }
  0x7c   :  { %1758 = vmatpush3.bf16.msra.mxu0 %v1755_v12 }
  0x7d   :  { %1760 = vmatprep.subr.bf16.mxu0 %v1759_v15 }
  0x80   :  { %1762 = vmatpush3.bf16.msra.mxu0 %v1759_v15 }
  0x81   :  { %1764 = vmatprep.subr.bf16.mxu0 %v1763_v18 }
  0x84   :  { %1766 = vmatpush3.bf16.msra.mxu0 %v1763_v18 }
  0x85   :  { %1768 = vmatprep.subr.bf16.mxu0 %v1767_v21 }
  0x88   :  { %1770 = vmatpush3.bf16.msra.mxu0 %v1767_v21 }
  0x89   :  { %1772 = vmatprep.subr.bf16.mxu0 %v1771_v24 }
  0x8c   :  { %1774 = vmatpush3.bf16.msra.mxu0 %v1771_v24 }
  0x8f   :  { %1604 = vmatmul.mubr.f32.vlgmr.msra.gmra.mrb[0].mxu0 %v2354_v25 }
 0x162   :  { %v2357_v26 = vpop.f32.mrb[0].mxu0 }
 0x163   :  { %v2359_v27 = vpop.f32.mrb[1].mxu0 }
 0x164   :  { %1610 = vmatprep.mubr.msk.f32.mxu1 %vm225_vm0, %v2359_v27  ;;  %v2365_v28 = vpack.i.bf16 %v2357_v26, %v2359_v27 }
 0x166   :  { %1910 = vrot.lane.b32.xlu0 %v2365_v28, %s2161_s6  ;;  %s1432_s6 = sshll.u32 %s2174_s20, 4  ;;  %s1433_s6 = int_to_ptr.vmem [resolvable:$true] %s1432_s6 }
 0x167   :  { %p2126_p7 = scmp.lt.s32.totalorder %s1433_s6, %s1433_s6 }
 0x1d8   :  { %v1911_v29 = vpop.permute.xlu0 %1910 }
 0x1d9   :  { %v1913_v30 = vunpack.i.h.bf16 %v1911_v29  ;;  %v1912_v31 = vunpack.i.l.bf16 %v1911_v29 }
 0x1db   :  { %v1775_v33 = vpack.c.bf16 %v1913_v30, %v1912_v31 }
 0x1dd   :  { %1777 = vmatprep.subr.msk.bf16.mxu1 %vm2370_vm1, %v1775_v33 }
 0x1de   :  { %1780 = vmatpush3.bf16.xpose.msk.msra.mxu1 %vm2370_vm1, %v1775_v33 }
 0x1e5   :  { %1611 = vmatmul.mubr.msk.f32.vlgmr.msra.gmra.mrb[0].mxu1 %vm225_vm0, %v2357_v26 }
 0x2b8   :  { %v1612_v36 = vpop.f32.mrb[0].mxu1 }
 0x2b9   :  { %v306_v37 = vadd.f32 %v1612_v36, %v2380_v34  ;;  %v300_v38 = vpop.f32.mrb[1].mxu1 }
 0x2ba   :  { %v301_v39 = vadd.f32 %v300_v38, %v2382_v35 }
 0x2bb   :  { %v313_v40 = vsel %vm309_vm2, %v306_v37, -inf }
 0x2bc   :  { %314 = vmax.xlane.f32.xlu1 %v313_v40  ;;  %v310_v41 = vsel %vm309_vm2, %v301_v39, -inf }
 0x2bd   :  { %311 = vmax.xlane.f32.xlu0 %v310_v41 }
 0x2cd   :  { %1915 = vrot.lane.b32.xlu1 %v2365_v28, %s2162_s23  ;;  %s2121_s23 = scalar_lea.vmem %s1433_s6, 256 }
 0x2ce   :  { %p2122_p6 = scmp.ne.s32.totalorder %s1433_s6, %s2121_s23  ;;  %p2127_p8 = scmp.lt.s32.totalorder %s2121_s23, %s2121_s23 }
 0x2d0   :  { %p2128_p9 = por %p2127_p8, %p2126_p7 }
 0x2d1   :  { %1920 = vrot.lane.b32.xlu1 %v2365_v28, %s2163_s25 }
 0x2d2   :  { %p2129_p10 = pnand %p2128_p9, %p2122_p6 }
 0x2d3   :  { %421 = vrot.lane.b32.xlu0 %v2357_v26, %s2164_s3 }
 0x349   :  { %v315_v42 = vpop.xlane.xlu1 %314 }
 0x34a   :  { %v317_v43 = vsub.f32 %v306_v37, %v315_v42  ;;  %v312_v44 = vpop.xlane.xlu0 %311 }
 0x34b   :  { %v316_v45 = vsub.f32 %v301_v39, %v312_v44 }
 0x34c   :  { %v320_v46 = vmul.f32 1.442695, %v317_v43 }
 0x34d   :  { %v318_v47 = vmul.f32 1.442695, %v316_v45  ;;  %v1916_v48 = vpop.permute.xlu1 %1915 }
 0x34e   :  { %1949 = vpow2.f32 %v320_v46  ;;  %v1918_v49 = vunpack.i.h.bf16 %v1916_v48  ;;  %v1917_v50 = vunpack.i.l.bf16 %v1916_v48  ;;  %v422_v3 = vpop.permute.xlu0 %421 }
 0x34f   :  { %1951 = vpow2.f32 %v318_v47 }
 0x350   :  { %v1781_v51 = vpack.c.bf16 %v1918_v49, %v1917_v50 }
 0x351   :  { %v1921_v52 = vpop.permute.xlu1 %1920 }
 0x352   :  { %v1923_v53 = vunpack.i.h.bf16 %v1921_v52  ;;  %v1922_v54 = vunpack.i.l.bf16 %v1921_v52  ;;  %1782 = vmatprep.subr.bf16.mxu1 %v1781_v51 }
 0x353   :  { %1784 = vmatpush3.bf16.msra.mxu1 %v1781_v51 }
 0x354   :  { %v1785_v55 = vpack.c.bf16 %v1923_v53, %v1922_v54 }
 0x356   :  { %1787 = vmatprep.subr.msk.bf16.mxu1 %vm2370_vm1, %v1785_v55 }
 0x358   :  { %v1950_v56 = vpop.eup %1949 }
 0x359   :  { %v325_v57 = vsel %vm309_vm2, %v1950_v56, 0.0  ;;  %v1952_v58 = vpop.eup %1951 }
 0x35a   :  { %326 = vadd.xlane.f32.xlu1 %v325_v57  ;;  %v322_v59 = vsel %vm309_vm2, %v1952_v58, 0.0 }
 0x35e   :  { %323 = vadd.xlane.f32.xlu1 %v322_v59 }
 0x36f   :  { %419 = vrot.lane.b32.xlu1 %v2359_v27, %s2164_s3 }
 0x3e7   :  { %v327_v60 = vpop.xlane.xlu1 %326 }
 0x3e8   :  { %1953 = vrcp.f32 %v327_v60 }
 0x3eb   :  { %v324_v61 = vpop.xlane.xlu1 %323 }
 0x3ec   :  { %1955 = vrcp.f32 %v324_v61 }
 0x3ef   :  { %v420_v2 = vpop.permute.xlu1 %419 }
 0x3f2   :  { %v1954_v62 = vpop.eup %1953 }
 0x3f3   :  { %v331_v1 = vmul.f32 %v1954_v62, %v1950_v56 }
 0x3f6   :  { %v1956_v63 = vpop.eup %1955 }
 0x3f7   :  { %v330_v0 = vmul.f32 %v1956_v63, %v1952_v58 }
 0x3f9   :  { %1617 = vmatprep.mubr.msk.f32.mxu1 %vm309_vm2, %v330_v0 }
 0x3fa   :  { %1618 = vmatmul.mubr.msk.f32.vlgmr.msra.gmra.mrb[2].mxu1 %vm309_vm2, %v331_v1 }
 0x3fb   :  { %1790 = vmatpush3.bf16.xpose.msk.msra.mxu1 %vm2370_vm1, %v1785_v55  ;;  %1624 = vmatprep.mubr.msk.f32.mxu1 %vm225_vm0, %v420_v2 }
 0x402   :  { %1625 = vmatmul.mubr.msk.f32.vlgmr.msra.gmra.mrb[4].mxu1 %vm225_vm0, %v422_v3 }
 0x4cd   :  { %v2402_v4 = vpop.f32.mrb[2].mxu1 }
 0x4ce   :  { %v2404_v5 = vpop.f32.mrb[3].mxu1 }
 0x4d5   :  { %v1626_v6 = vpop.f32.mrb[4].mxu1 }
 0x4d6   :  { %v507_v7 = vadd.f32 %v1626_v6, %v2380_v34  ;;  %v501_v8 = vpop.f32.mrb[5].mxu1 }
 0x4d7   :  { %v502_v10 = vadd.f32 %v501_v8, %v2382_v35 }
 0x4d8   :  { %v513_v11 = vsel %vm309_vm2, %v507_v7, -inf }
 0x4d9   :  { %514 = vmax.xlane.f32.xlu0 %v513_v11  ;;  %v510_v12 = vsel %vm309_vm2, %v502_v10, -inf }
 0x4da   :  { %511 = vmax.xlane.f32.xlu1 %v510_v12 }
 0x4eb   :  { %1925 = vrot.lane.b32.xlu1 %v2365_v28, %s2165_s24 }
 0x4ef   :  { %1930 = vrot.lane.b32.xlu0 %v2365_v28, %s2166_s26  ;;  %619 = vrot.lane.b32.xlu1 %v2359_v27, %s2167_s27 }
 0x566   :  { %v515_v13 = vpop.xlane.xlu0 %514 }
 0x567   :  { %v517_v14 = vsub.f32 %v507_v7, %v515_v13  ;;  %v512_v15 = vpop.xlane.xlu1 %511 }
 0x568   :  { %v516_v16 = vsub.f32 %v502_v10, %v512_v15 }
 0x569   :  { %v520_v17 = vmul.f32 1.442695, %v517_v14 }
 0x56a   :  { %v518_v18 = vmul.f32 1.442695, %v516_v16  ;;  %v1931_v19 = vpop.permute.xlu0 %1930 }
 0x56b   :  { %1957 = vpow2.f32 %v520_v17  ;;  %v1926_v20 = vpop.permute.xlu1 %1925  ;;  %v1933_v21 = vunpack.i.h.bf16 %v1931_v19  ;;  %v1932_v22 = vunpack.i.l.bf16 %v1931_v19 }
 0x56c   :  { %v1928_v23 = vunpack.i.h.bf16 %v1926_v20  ;;  %v1927_v24 = vunpack.i.l.bf16 %v1926_v20  ;;  %1959 = vpow2.f32 %v518_v18 }
 0x56d   :  { %v1795_v30 = vpack.c.bf16 %v1933_v21, %v1932_v22 }
 0x56e   :  { %v1791_v29 = vpack.c.bf16 %v1928_v23, %v1927_v24 }
 0x56f   :  { %v620_v38 = vpop.permute.xlu1 %619 }
 0x570   :  { %1792 = vmatprep.subr.bf16.mxu1 %v1791_v29 }
 0x571   :  { %1794 = vmatpush3.bf16.msra.mxu1 %v1791_v29 }
 0x572   :  { %1797 = vmatprep.subr.msk.bf16.mxu1 %vm2370_vm1, %v1795_v30 }
 0x575   :  { %v1958_v31 = vpop.eup %1957 }
 0x576   :  { %v525_v33 = vsel %vm309_vm2, %v1958_v31, 0.0  ;;  %v1960_v36 = vpop.eup %1959 }
 0x577   :  { %526 = vadd.xlane.f32.xlu1 %v525_v33  ;;  %v522_v37 = vsel %vm309_vm2, %v1960_v36, 0.0 }
 0x57b   :  { %523 = vadd.xlane.f32.xlu1 %v522_v37 }
 0x58c   :  { %621 = vrot.lane.b32.xlu1 %v2357_v26, %s2167_s27 }
 0x604   :  { %v527_v39 = vpop.xlane.xlu1 %526 }
 0x605   :  { %1961 = vrcp.f32 %v527_v39 }
 0x608   :  { %v524_v40 = vpop.xlane.xlu1 %523 }
 0x609   :  { %1963 = vrcp.f32 %v524_v40 }
 0x60c   :  { %v622_v45 = vpop.permute.xlu1 %621 }
 0x60f   :  { %v1962_v41 = vpop.eup %1961 }
 0x610   :  { %v531_v44 = vmul.f32 %v1962_v41, %v1958_v31 }
 0x613   :  { %v1964_v42 = vpop.eup %1963 }
 0x614   :  { %v530_v43 = vmul.f32 %v1964_v42, %v1960_v36 }
 0x616   :  { %1631 = vmatprep.mubr.msk.f32.mxu1 %vm309_vm2, %v530_v43 }
 0x617   :  { %1632 = vmatmul.mubr.msk.f32.vlgmr.msra.gmra.mrb[6].mxu1 %vm309_vm2, %v531_v44 }
 0x618   :  { %1800 = vmatpush3.bf16.xpose.msk.msra.mxu1 %vm2370_vm1, %v1795_v30  ;;  %1638 = vmatprep.mubr.msk.f32.mxu1 %vm225_vm0, %v620_v38 }
 0x61f   :  { %1639 = vmatmul.mubr.msk.f32.vlgmr.msra.gmra.mrb[8].mxu1 %vm225_vm0, %v622_v45 }
 0x6ea   :  { %v2424_v46 = vpop.f32.mrb[6].mxu1 }
 0x6eb   :  { %v2426_v47 = vpop.f32.mrb[7].mxu1 }
 0x6f2   :  { %v1640_v48 = vpop.f32.mrb[8].mxu1 }
 0x6f3   :  { %v707_v49 = vadd.f32 %v1640_v48, %v2380_v34  ;;  %v701_v50 = vpop.f32.mrb[9].mxu1 }
 0x6f4   :  { %v702_v51 = vadd.f32 %v701_v50, %v2382_v35  ;;  %v1052_v50 = vld [vmem:[#allocation8 + $0x10] sm:$0xff] }
 0x6f5   :  { %v713_v52 = vsel %vm309_vm2, %v707_v49, -inf }
 0x6f6   :  { %714 = vmax.xlane.f32.xlu0 %v713_v52  ;;  %v710_v53 = vsel %vm309_vm2, %v702_v51, -inf  ;;  %v1053_v52 = vld [vmem:[#allocation8 + $0x18] sm:$0xff] }
 0x6f7   :  { %711 = vmax.xlane.f32.xlu1 %v710_v53  ;;  %v1819_v53 = vpack.c.bf16 %v1053_v52, %v1052_v50  ;;  %v1287_v50 = vld [vmem:[#allocation11 + $0x20] sm:$0xff] }
 0x783   :  { %v715_v54 = vpop.xlane.xlu0 %714 }
 0x784   :  { %v717_v55 = vsub.f32 %v707_v49, %v715_v54  ;;  %v712_v56 = vpop.xlane.xlu1 %711  ;;  %v1051_v49 = vld [vmem:[#allocation8 + $0x8] sm:$0xff] }
 0x785   :  { %v716_v57 = vsub.f32 %v702_v51, %v712_v56 }
 0x786   :  { %v720_v58 = vmul.f32 1.442695, %v717_v55 }
 0x787   :  { %v718_v59 = vmul.f32 1.442695, %v716_v57 }
 0x788   :  { %1965 = vpow2.f32 %v720_v58 }
 0x789   :  { %1967 = vpow2.f32 %v718_v59 }
 0x792   :  { %v1966_v60 = vpop.eup %1965 }
 0x793   :  { %v1968_v61 = vpop.eup %1967  ;;  %v725_v62 = vsel %vm309_vm2, %v1966_v60, 0.0 }
 0x794   :  { %726 = vadd.xlane.f32.xlu1 %v725_v62  ;;  %v722_v63 = vsel %vm309_vm2, %v1968_v61, 0.0 }
 0x795   :  { %723 = vadd.xlane.f32.xlu0 %v722_v63 }
 0x7a5   :  { %1940 = vrot.lane.b32.xlu1 %v2365_v28, %s2168_s28 }
 0x7a9   :  { %819 = vrot.lane.b32.xlu1 %v2359_v27, %s2169_s1 }
 0x7ab   :  { %1935 = vrot.lane.b32.xlu0 %v2365_v28, %s2170_s2 }
 0x7af   :  { %821 = vrot.lane.b32.xlu0 %v2357_v26, %s2169_s1 }
 0x821   :  { %v727_v0 = vpop.xlane.xlu1 %726 }
 0x822   :  { %1969 = vrcp.f32 %v727_v0  ;;  %v724_v1 = vpop.xlane.xlu0 %723 }
 0x823   :  { %1971 = vrcp.f32 %v724_v1 }
 0x825   :  { %v1941_v2 = vpop.permute.xlu1 %1940 }
 0x826   :  { %v1936_v3 = vpop.permute.xlu0 %1935  ;;  %v1943_v6 = vunpack.i.h.bf16 %v1941_v2  ;;  %v1942_v7 = vunpack.i.l.bf16 %v1941_v2 }
 0x827   :  { %v1938_v8 = vunpack.i.h.bf16 %v1936_v3  ;;  %v1937_v10 = vunpack.i.l.bf16 %v1936_v3 }
 0x828   :  { %v1805_v12 = vpack.c.bf16 %v1943_v6, %v1942_v7 }
 0x829   :  { %v1801_v11 = vpack.c.bf16 %v1938_v8, %v1937_v10  ;;  %v820_v15 = vpop.permute.xlu1 %819  ;;  %v1183_v10 = vld [vmem:[#allocation10] sm:$0xff] }
 0x82a   :  { %v822_v16 = vpop.permute.xlu0 %821 }
 0x82b   :  { %1802 = vmatprep.subr.bf16.mxu1 %v1801_v11 }
 0x82c   :  { %v1970_v13 = vpop.eup %1969  ;;  %1804 = vmatpush3.bf16.msra.mxu1 %v1801_v11  ;;  %v1184_v11 = vld [vmem:[#allocation10 + $0x8] sm:$0xff] }
 0x82d   :  { %v1972_v27 = vpop.eup %1971  ;;  %1807 = vmatprep.subr.msk.bf16.mxu1 %vm2370_vm1, %v1805_v12  ;;  %v731_v14 = vmul.f32 %v1970_v13, %v1966_v60  ;;  %v1186_v13 = vld [vmem:[#allocation10 + $0x18] sm:$0xff] }
 0x82e   :  { %v730_v26 = vmul.f32 %v1972_v27, %v1968_v61 }
 0x830   :  { %1645 = vmatprep.mubr.msk.f32.mxu1 %vm309_vm2, %v730_v26  ;;  %v1136_v26 = vlaneseq }
 0x831   :  { %1646 = vmatmul.mubr.msk.f32.vlgmr.msra.gmra.mrb[10].mxu1 %vm309_vm2, %v731_v14 }
 0x832   :  { %1652 = vmatprep.mubr.msk.f32.mxu1 %vm225_vm0, %v820_v15  ;;  %v2467_v14 = vand.u32 127, %v1136_v26 }
 0x834   :  { %vm1138_vm5 = vcmp.lt.s32.totalorder %v2467_v14, 32  ;;  %v1478_v14 = vld [vmem:[%s2532_s11] ss:$0 sm:$0xff] }
 0x835   :  { %1810 = vmatpush3.bf16.xpose.msk.msra.mxu1 %vm2370_vm1, %v1805_v12  ;;  %v1823_v12 = vpack.c.bf16 %v1184_v11, %v1183_v10  ;;  %v1473_v10 = vld [vmem:[%s2529_s8] ss:$0 sm:$0xff] }
 0x837   :  { %1824 = vmatprep.subr.bf16.mxu1 %v1823_v12 }
 0x83c   :  { %1653 = vmatmul.mubr.msk.f32.vlgmr.msra.gmra.mrb[12].mxu1 %vm225_vm0, %v822_v16 }
 0x83d   :  { %1826 = vmatpush3.bf16.msra.mxu1 %v1823_v12 }
 0x904   :  { %v1647_v17 = vpop.f32.mrb[10].mxu1 }
 0x905   :  { %v810_v18 = vpop.f32.mrb[11].mxu1 }
 0x90f   :  { %v1654_v19 = vpop.f32.mrb[12].mxu1 }
 0x910   :  { %v907_v20 = vadd.f32 %v1654_v19, %v2380_v34  ;;  %v901_v21 = vpop.f32.mrb[13].mxu1 }
 0x911   :  { %v902_v22 = vadd.f32 %v901_v21, %v2382_v35 }
 0x912   :  { %v913_v23 = vsel %vm309_vm2, %v907_v20, -inf }
 0x913   :  { %914 = vmax.xlane.f32.xlu0 %v913_v23  ;;  %v910_v24 = vsel %vm309_vm2, %v902_v22, -inf  ;;  %v1187_v23 = vld [vmem:[#allocation10 + $0x20] sm:$0xff] }
 0x914   :  { %911 = vmax.xlane.f32.xlu1 %v910_v24  ;;  %v1188_v24 = vld [vmem:[#allocation10 + $0x28] sm:$0xff] }
 0x9a0   :  { %v915_v29 = vpop.xlane.xlu0 %914 }
 0x9a1   :  { %v917_v32 = vsub.f32 %v907_v20, %v915_v29  ;;  %v912_v30 = vpop.xlane.xlu1 %911  ;;  %v1831_v29 = vpack.c.bf16 %v1188_v24, %v1187_v23 }
 0x9a2   :  { %v916_v31 = vsub.f32 %v902_v22, %v912_v30  ;;  %v1190_v30 = vld [vmem:[#allocation10 + $0x38] sm:$0xff] }
 0x9a3   :  { %v920_v33 = vmul.f32 1.442695, %v917_v32  ;;  %v1189_v32 = vld [vmem:[#allocation10 + $0x30] sm:$0xff] }
 0x9a4   :  { %v918_v36 = vmul.f32 1.442695, %v916_v31  ;;  %v1835_v31 = vpack.c.bf16 %v1190_v30, %v1189_v32 }
 0x9a5   :  { %1973 = vpow2.f32 %v920_v33  ;;  %v1191_v33 = vld [vmem:[#allocation10 + $0x40] sm:$0xff] }
 0x9a6   :  { %1975 = vpow2.f32 %v918_v36  ;;  %v1192_v36 = vld [vmem:[#allocation10 + $0x48] sm:$0xff] }
 0x9af   :  { %v1974_v37 = vpop.eup %1973 }
 0x9b0   :  { %v1976_v38 = vpop.eup %1975  ;;  %v925_v34 = vsel %vm309_vm2, %v1974_v37, 0.0 }
 0x9b1   :  { %926 = vadd.xlane.f32.xlu1 %v925_v34  ;;  %v922_v35 = vsel %vm309_vm2, %v1976_v38, 0.0  ;;  %v1194_v34 = vld [vmem:[#allocation10 + $0x58] sm:$0xff] }
 0x9b2   :  { %923 = vadd.xlane.f32.xlu0 %v922_v35  ;;  %v1195_v35 = vld [vmem:[#allocation10 + $0x60] sm:$0xff] }
 0x9c2   :  { %1021 = vrot.lane.b32.xlu1 %v2426_v47, %s2156_s16 }
 0x9c6   :  { %1023 = vrot.lane.b32.xlu1 %v2424_v46, %s2156_s16 }
 0x9c8   :  { %1945 = vrot.lane.b32.xlu0 %v2365_v28, %s2171_s14  ;;  %v1050_v28 = vld [vmem:[#allocation8] sm:$0xff] }
 0x9c9   :  { %v1815_v51 = vpack.c.bf16 %v1051_v49, %v1050_v28  ;;  %v1286_v28 = vld [vmem:[#allocation11 + $0x18] sm:$0xff] }
 0x9ca   :  { %1031 = vrot.lane.b32.xlu1 %v1647_v17, %s2172_s22 }
 0x9cc   :  { %1029 = vrot.lane.b32.xlu0 %v810_v18, %s2172_s22 }
 0xa3e   :  { %v927_v39 = vpop.xlane.xlu1 %926 }
 0xa3f   :  { %1977 = vrcp.f32 %v927_v39  ;;  %v924_v40 = vpop.xlane.xlu0 %923 }
 0xa40   :  { %1979 = vrcp.f32 %v924_v40  ;;  %v1196_v40 = vld [vmem:[#allocation10 + $0x68] sm:$0xff] }
 0xa42   :  { %v1022_v56 = vpop.permute.xlu1 %1021 }
 0xa43   :  { %v1946_v41 = vpop.permute.xlu0 %1945  ;;  %v1043_v60 = vsel %vm225_vm0, %v2404_v5, %v1022_v56  ;;  %v1291_v56 = vld [vmem:[#allocation11 + $0x40] sm:$0xff] }
 0xa44   :  { %v1948_v42 = vunpack.i.h.bf16 %v1946_v41  ;;  %v1947_v43 = vunpack.i.l.bf16 %v1946_v41  ;;  %v1847_v41 = vpack.c.bf16 %v1196_v40, %v1195_v35 }
 0xa46   :  { %v1811_v44 = vpack.c.bf16 %v1948_v42, %v1947_v43  ;;  %v1024_v57 = vpop.permute.xlu1 %1023  ;;  %v1197_v42 = vld [vmem:[#allocation10 + $0x70] sm:$0xff]  ;;  %v1198_v43 = vld [vmem:[#allocation10 + $0x78] sm:$0xff] }
 0xa47   :  { %v1030_v59 = vpop.permute.xlu0 %1029  ;;  %v1044_v62 = vsel %vm225_vm0, %v2402_v4, %v1024_v57  ;;  %v1185_v4 = vld [vmem:[#allocation10 + $0x10] sm:$0xff]  ;;  %v1292_v57 = vld [vmem:[#allocation11 + $0x48] sm:$0xff] }
 0xa48   :  { %1812 = vmatprep.subr.bf16.mxu0 %v1811_v44  ;;  %v1045_v63 = vsel %vm309_vm2, %v1043_v60, %v1030_v59  ;;  %v1827_v27 = vpack.c.bf16 %v1186_v13, %v1185_v4  ;;  %v1293_v59 = vld [vmem:[#allocation11 + $0x50] sm:$0xff]  ;;  %v1294_v60 = vld [vmem:[#allocation11 + $0x58] sm:$0xff]  ;;  %v1474_v4 = vld [vmem:[%s2530_s9] ss:$0 sm:$0xff] }
 0xa49   :  { %v1978_v45 = vpop.eup %1977  ;;  %1814 = vmatpush3.bf16.msra.mxu0 %v1811_v44  ;;  %v1851_v44 = vpack.c.bf16 %v1198_v43, %v1197_v42 }
 0xa4a   :  { %v1980_v47 = vpop.eup %1979  ;;  %v931_v46 = vmul.f32 %v1978_v45, %v1974_v37  ;;  %1816 = vmatprep.subr.bf16.mxu0 %v1815_v51  ;;  %v1032_v58 = vpop.permute.xlu1 %1031  ;;  %1828 = vmatprep.subr.bf16.mxu1 %v1827_v27  ;;  %v1839_v37 = vpack.c.bf16 %v1192_v36, %v1191_v33  ;;  %v1283_v45 = vld [vmem:[#allocation11] sm:$0xff] }
 0xa4b   :  { %v930_v48 = vmul.f32 %v1980_v47, %v1976_v38  ;;  %v1046_v1 = vsel %vm309_vm2, %v1044_v62, %v1032_v58  ;;  %1830 = vmatpush3.bf16.msra.mxu1 %v1827_v27  ;;  %v1193_v38 = vld [vmem:[#allocation10 + $0x50] sm:$0xff]  ;;  %v1284_v47 = vld [vmem:[#allocation11 + $0x8] sm:$0xff]  ;;  %v1871_v58 = vpack.c.bf16 %v1292_v57, %v1291_v56  ;;  %v1295_v62 = vld [vmem:[#allocation11 + $0x60] sm:$0xff] }
 0xa4c   :  { %1832 = vmatprep.subr.bf16.mxu1 %v1831_v29  ;;  %v1843_v39 = vpack.c.bf16 %v1194_v34, %v1193_v38 }
 0xa4d   :  { %1659 = vmatprep.mubr.msk.f32.mxu0 %vm309_vm2, %v930_v48  ;;  %v1285_v48 = vld [vmem:[#allocation11 + $0x10] sm:$0xff] }
 0xa4e   :  { %1660 = vmatmul.mubr.msk.f32.vlgmr.msra.gmra.mrb[2].mxu0 %vm309_vm2, %v931_v46  ;;  %v1855_v46 = vpack.c.bf16 %v1284_v47, %v1283_v45  ;;  %v1859_v49 = vpack.c.bf16 %v1286_v28, %v1285_v48 }
 0xa4f   :  { %1818 = vmatpush3.bf16.msra.mxu0 %v1815_v51  ;;  %1834 = vmatpush3.bf16.msra.mxu1 %v1831_v29  ;;  %v1288_v51 = vld [vmem:[#allocation11 + $0x28] sm:$0xff]  ;;  %v1476_v29 = vld [vmem:[%s2528_s7] ss:$0 sm:$0xff] }
 0xa50   :  { %1820 = vmatprep.subr.bf16.mxu0 %v1819_v53  ;;  %1836 = vmatprep.subr.bf16.mxu1 %v1835_v31  ;;  %v1863_v52 = vpack.c.bf16 %v1288_v51, %v1287_v50 }
 0xa53   :  { %1822 = vmatpush3.bf16.msra.mxu0 %v1819_v53  ;;  %1838 = vmatpush3.bf16.msra.mxu1 %v1835_v31  ;;  %v1289_v53 = vld [vmem:[#allocation11 + $0x30] sm:$0xff] }
 0xa54   :  { %1840 = vmatprep.subr.bf16.mxu1 %v1839_v37  ;;  %1856 = vmatprep.subr.bf16.mxu0 %v1855_v46 }
 0xa57   :  { %1842 = vmatpush3.bf16.msra.mxu1 %v1839_v37 }
 0xa58   :  { %1844 = vmatprep.subr.bf16.mxu1 %v1843_v39 }
 0xa5b   :  { %1846 = vmatpush3.bf16.msra.mxu1 %v1843_v39 }
 0xa5c   :  { %1848 = vmatprep.subr.bf16.mxu1 %v1847_v41 }
 0xa5f   :  { %1850 = vmatpush3.bf16.msra.mxu1 %v1847_v41 }
 0xa60   :  { %1852 = vmatprep.subr.bf16.mxu1 %v1851_v44 }
 0xa63   :  { %1854 = vmatpush3.bf16.msra.mxu1 %v1851_v44 }
 0xb21   :  { %v1661_v54 = vpop.f32.mrb[2].mxu0 }
 0xb22   :  { %1039 = vrot.lane.b32.xlu1 %v1661_v54, %s2173_s29  ;;  %v1010_v55 = vpop.f32.mrb[3].mxu0  ;;  %v1290_v54 = vld [vmem:[#allocation11 + $0x38] sm:$0xff] }
 0xb23   :  { %1037 = vrot.lane.b32.xlu0 %v1010_v55, %s2173_s29  ;;  %v1867_v55 = vpack.c.bf16 %v1290_v54, %v1289_v53 }
 0xb94   :  { %v1040_v61 = vpop.permute.xlu1 %1039 }
 0xb95   :  { %v1038_v0 = vpop.permute.xlu0 %1037  ;;  %v1049_v3 = vsel %vm1047_vm3, %v1046_v1, %v1040_v61  ;;  %v1875_v61 = vpack.c.bf16 %v1294_v60, %v1293_v59 }
 0xb96   :  { %v1048_v2 = vsel %vm1047_vm3, %v1045_v63, %v1038_v0  ;;  %v1296_v63 = vld [vmem:[#allocation11 + $0x68] sm:$0xff] }
 0xb97   :  { %1670 = vmatprep.mubr.msk.f32.mxu0 %vm1054_vm4, %v1048_v2  ;;  %v1879_v0 = vpack.c.bf16 %v1296_v63, %v1295_v62 }
 0xb98   :  { %1671 = vmatmul.mubr.msk.f32.vlgmr.msra.gmra.mrb[4].mxu0 %vm1054_vm4, %v1049_v3 }
 0xb99   :  { %1858 = vmatpush3.bf16.msra.mxu0 %v1855_v46 }
 0xb9a   :  { %1860 = vmatprep.subr.bf16.mxu0 %v1859_v49 }
 0xb9d   :  { %1862 = vmatpush3.bf16.msra.mxu0 %v1859_v49 }
 0xb9e   :  { %1864 = vmatprep.subr.bf16.mxu0 %v1863_v52 }
 0xba1   :  { %1866 = vmatpush3.bf16.msra.mxu0 %v1863_v52  ;;  %v1477_v52 = vld [vmem:[%s2531_s10] ss:$0 sm:$0xff] }
 0xba2   :  { %1868 = vmatprep.subr.bf16.mxu0 %v1867_v55 }
 0xba5   :  { %1870 = vmatpush3.bf16.msra.mxu0 %v1867_v55 }
 0xba6   :  { %1872 = vmatprep.subr.bf16.mxu0 %v1871_v58 }
 0xba9   :  { %1874 = vmatpush3.bf16.msra.mxu0 %v1871_v58 }
 0xbaa   :  { %1876 = vmatprep.subr.bf16.mxu0 %v1875_v61 }
 0xbad   :  { %1878 = vmatpush3.bf16.msra.mxu0 %v1875_v61 }
 0xbae   :  { %1880 = vmatprep.subr.bf16.mxu0 %v1879_v0 }
 0xbb1   :  { %1882 = vmatpush3.bf16.msra.mxu0 %v1879_v0 }
 0xc6b   :  { %v1672_v6 = vpop.f32.mrb[4].mxu0 }
 0xc6c   :  { %v1140_v7 = vadd.f32 %v1672_v6, %v2354_v25  ;;  %v1127_v8 = vpop.f32.mrb[5].mxu0 }
 0xc6d   :  { %v1139_v5 = vadd.f32 %v1127_v8, %v2351_v9 }
 0xc6e   :  { %1145 = vadd.xlane.f32.xlu1 %v1140_v7 }
 0xc6f   :  { %1143 = vadd.xlane.f32.xlu0 %v1139_v5 }
 0xcfb   :  { %v1146_v15 = vpop.xlane.xlu1 %1145 }
 0xcfc   :  { %v1148_v25 = vmul.f32 0.03125, %v1146_v15  ;;  %v1144_v16 = vpop.xlane.xlu0 %1143 }
 0xcfd   :  { %v1147_v17 = vmul.f32 0.03125, %v1144_v16  ;;  %v1297_v16 = vld [vmem:[#allocation11 + $0x70] sm:$0xff] }
 0xcfe   :  { %v1150_v9 = vsub.f32 %v1140_v7, %v1148_v25 }
 0xcff   :  { %v1149_v18 = vsub.f32 %v1139_v5, %v1147_v17  ;;  %v1298_v17 = vld [vmem:[#allocation11 + $0x78] sm:$0xff] }
 0xd00   :  { %v2478_v21 = vsel %vm1138_vm5, %v1150_v9, 0.0  ;;  %v1883_v9 = vpack.c.bf16 %v1298_v17, %v1297_v16 }
 0xd01   :  { %v2472_v19 = vsel %vm1138_vm5, %v1149_v18, 0.0  ;;  %v1154_v22 = vmul.f32 %v2478_v21, %v2478_v21  ;;  %v1475_v18 = vld [vmem:[%s2526_s5] ss:$0 sm:$0xff] }
 0xd02   :  { %v1153_v20 = vmul.f32 %v2472_v19, %v2472_v19  ;;  %1884 = vmatprep.subr.bf16.mxu0 %v1883_v9 }
 0xd03   :  { %1886 = vmatpush3.bf16.msra.mxu0 %v1883_v9 }
 0xd04   :  { %1155 = vadd.xlane.f32.xlu0 %v1153_v20 }
 0xd08   :  { %1157 = vadd.xlane.f32.xlu0 %v1154_v22 }
 0xd91   :  { %v1156_v1 = vpop.xlane.xlu0 %1155 }
 0xd92   :  { %v1159_v2 = vmul.f32 0.03125, %v1156_v1 }
 0xd94   :  { %v1161_v3 = vadd.f32 1e-05, %v1159_v2 }
 0xd95   :  { %v1158_v6 = vpop.xlane.xlu0 %1157 }
 0xd96   :  { %1981 = vrsqrt.f32 %v1161_v3  ;;  %v1160_v7 = vmul.f32 0.03125, %v1158_v6 }
 0xd98   :  { %v1162_v8 = vadd.f32 1e-05, %v1160_v7 }
 0xd9a   :  { %1983 = vrsqrt.f32 %v1162_v8 }
 0xda0   :  { %v1982_v5 = vpop.eup %1981 }
 0xda1   :  { %v1165_v11 = vmul.f32 %v1982_v5, %v2472_v19 }
 0xda3   :  { %v1173_v12 = vmul.f32 %v1473_v10, %v1165_v11 }
 0xda4   :  { %v1984_v13 = vpop.eup %1983 }
 0xda5   :  { %v1166_v27 = vmul.f32 %v1984_v13, %v2478_v21  ;;  %v1181_v26 = vadd.f32 %v1474_v4, %v1173_v12 }
 0xda7   :  { %v1174_v15 = vmul.f32 %v1473_v10, %v1166_v27  ;;  %1705 = vmatprep.mubr.f32.mxu1 %v1181_v26 }
 0xda9   :  { %v1182_v25 = vadd.f32 %v1474_v4, %v1174_v15 }
 0xdab   :  { %1706 = vmatmul.mubr.f32.vlgmr.msra.gmra.mrb[14].mxu1 %v1182_v25 }
 0xe7e   :  { %v1707_v19 = vpop.f32.mrb[14].mxu1 }
 0xe7f   :  { %v1278_v20 = vadd.f32 %v1707_v19, %v1475_v18  ;;  %v1272_v22 = vpop.f32.mrb[15].mxu1 }
 0xe80   :  { %v1273_v23 = vadd.f32 %v1475_v18, %v1272_v22 }
 0xe81   :  { %v1282_v21 = vmax.f32 %v1278_v20, 0.0 }
 0xe82   :  { %v1281_v24 = vmax.f32 %v1273_v23, 0.0 }
 0xe84   :  { %1740 = vmatprep.mubr.f32.mxu0 %v1281_v24 }
 0xe85   :  { %1741 = vmatmul.mubr.f32.vlgmr.msra.gmra.mrb[6].mxu0 %v1282_v21 }
 0xf58   :  { %v1742_v32 = vpop.f32.mrb[6].mxu0 }
 0xf59   :  { %v1378_v30 = vadd.f32 %v1742_v32, %v1476_v29  ;;  %v1372_v31 = vpop.f32.mrb[7].mxu0 }
 0xf5a   :  { %v1373_v33 = vadd.f32 %v1476_v29, %v1372_v31 }
 0xf5b   :  { %v1382_v36 = vadd.f32 %v1378_v30, %v1182_v25 }
 0xf5c   :  { %v1381_v37 = vadd.f32 %v1373_v33, %v1181_v26 }
 0xf5d   :  { %1387 = vadd.xlane.f32.xlu0 %v1382_v36 }
 0xf5e   :  { %1385 = vadd.xlane.f32.xlu1 %v1381_v37 }
 0xfea   :  { %v1388_v38 = vpop.xlane.xlu0 %1387 }
 0xfeb   :  { %v1390_v34 = vmul.f32 0.03125, %v1388_v38  ;;  %v1386_v35 = vpop.xlane.xlu1 %1385 }
 0xfec   :  { %v1389_v39 = vmul.f32 0.03125, %v1386_v35 }
 0xfed   :  { %v1392_v40 = vsub.f32 %v1382_v36, %v1390_v34 }
 0xfee   :  { %v1391_v41 = vsub.f32 %v1381_v37, %v1389_v39 }
 0xfef   :  { %v1394_v42 = vsel %vm1138_vm5, %v1392_v40, 0.0 }
 0xff0   :  { %v1396_v43 = vmul.f32 %v1394_v42, %v1394_v42  ;;  %v1393_v44 = vsel %vm1138_vm5, %v1391_v41, 0.0 }
 0xff1   :  { %v1395_v45 = vmul.f32 %v1393_v44, %v1393_v44 }
 0xff2   :  { %1399 = vadd.xlane.f32.xlu0 %v1396_v43 }
 0xff3   :  { %1397 = vadd.xlane.f32.xlu1 %v1395_v45 }
0x107f   :  { %v1400_v47 = vpop.xlane.xlu0 %1399 }
0x1080   :  { %v1402_v48 = vmul.f32 0.03125, %v1400_v47  ;;  %v1398_v46 = vpop.xlane.xlu1 %1397 }
0x1081   :  { %v1401_v28 = vmul.f32 0.03125, %v1398_v46 }
0x1082   :  { %v1404_v49 = vadd.f32 1e-05, %v1402_v48 }
0x1083   :  { %v1403_v50 = vadd.f32 1e-05, %v1401_v28 }
0x1084   :  { %1985 = vrsqrt.f32 %v1404_v49 }
0x1085   :  { %1987 = vrsqrt.f32 %v1403_v50 }
0x108e   :  { %v1986_v51 = vpop.eup %1985 }
0x108f   :  { %v1988_v53 = vpop.eup %1987  ;;  %v1408_v54 = vmul.f32 %v1986_v51, %v1394_v42 }
0x1090   :  { %v1407_v55 = vmul.f32 %v1988_v53, %v1393_v44 }
0x1091   :  { %v1416_v56 = vmul.f32 %v1477_v52, %v1408_v54 }
0x1092   :  { %v1415_v57 = vmul.f32 %v1477_v52, %v1407_v55 }
0x1093   :  { %v1424_v58 = vadd.f32 %v1478_v14, %v1416_v56 }
0x1094   :  { %v1423_v59 = vadd.f32 %v1478_v14, %v1415_v57 }
0x1095   :  { %1426 = vst [vmem:[#allocation13 + $0x8] sm:$0xff] %v1424_v58 }
0x1096   :  { %1425 = vst [vmem:[#allocation13] sm:$0xff] %v1423_v59 }
0x1097   :  { %2132 = shalt.err (!%p2129_p10)
}
0x1098   :  { %s2133_s11 = scalar_lea.hbm %s2533_s12, 256 }
0x1099   :  { %p2134_p11 = scmp.ne.s32.totalorder %s2533_s12, %s2133_s11  ;;  %p2137_p12 = scmp.lt.u32.totalorder %s2133_s11, %s2533_s12 }
0x109b   :  { %p2139_p13 = pnand %p2137_p12, %p2134_p11 }
0x109d   :  { %2142 = shalt.err (!%p2139_p13)
}
0x109e   :  { %1438 = dma.vmem_to_hbm [thread:$0]  %s1433_s6, 256, %s2533_s12, [#allocation4], %s2155_s15, %s2155_s15, %s2156_s16  }
0x109f   :  { %2151 = dma.done.wait [#allocation4], 256  }
0x10a0   :  { %2152 = vsyncadd [#allocation4], 4294967040 }
0x10a1   :  { %1442 = vsyncpa [#allocation3], 1 }
0x10a2   :  { %1443 = vsyncpa [#allocation6], 1 }
0x10a3   :  { %1444 = vsyncpa [#allocation9], 1 }
0x10a4   :  { %1445 = vsyncpa [#allocation12], 1 }
0x10a5   :  { %1446 = vsyncpa [#allocation4], 1 }

</bundles_post_ra>
